<compile_context>
chip_gen: v7x
topology: tpu7x:2x2x1
jax: 0.10.0
libtpu: 0.0.40
codegen_flags: <defaults>
</compile_context>

<pallas_src>
import functools

import jax
import jax.numpy as jnp
from jax import lax
from jax.experimental import pallas as pl
from jax.experimental.pallas import tpu as pltpu

_LANE = 128
_MAX_BLOCK_ROWS = 4096   # 4096 * 128 * 4 B = 2 MiB per f32 block buffer


def _hash_u32(elem_u32, seed_u32, stream: int):
    """Portable stateless counter RNG (lowbias32-style avalanche), VPU-only.

    Fallback path for non-TPU backends / interpret mode; identical results for
    any tiling / grid order, tiles independent.
    """
    x = elem_u32 * jnp.uint32(0x9E3779B9)
    x = x ^ (seed_u32 * jnp.uint32(0x85EBCA6B) + jnp.uint32(stream))
    x = x ^ (x >> 16)
    x = x * jnp.uint32(0x7FEB352D)
    x = x ^ (x >> 15)
    x = x * jnp.uint32(0x846CA68B)
    x = x ^ (x >> 16)
    x = x * jnp.uint32(0x9E3779B1)
    x = x ^ (x >> 15)
    return x


def _bits_to_unit_float(bits_u32):
    """Top 23 random bits -> uniform float32 in [0, 1) via the mantissa trick."""
    mant = (bits_u32 >> 9) | jnp.uint32(0x3F800000)          # float in [1, 2)
    return lax.bitcast_convert_type(mant, jnp.float32) - jnp.float32(1.0)


def _sigmoid_pcff_kernel(seed_ref, x_ref, o_ref, *, hardness, block_rows, use_hw_prng):
    # Only called on the training & hardness > 0 path (wrapper handles eval).
    x = x_ref[...].astype(jnp.float32)
    sig = 1.0 / (1.0 + jnp.exp(-x))          # exact sigmoid (EUP exp, cheap)
    shape = x.shape
    need_mask = hardness < 1.0

    if use_hw_prng:
        # Hardware PRNG, re-seeded per tile from (seed, tile index) -> tiles
        # independent, grid axis stays "parallel"; bit generation is nearly
        # free compared with a software hash.
        pltpu.prng_seed(seed_ref[0], pl.program_id(0))
        sample_bits = pltpu.prng_random_bits(shape).astype(jnp.uint32)
        mask_bits = (pltpu.prng_random_bits(shape).astype(jnp.uint32)
                     if need_mask else None)
    else:
        # Portable counter-based fallback (plain VPU ops only).
        row = lax.broadcasted_iota(jnp.int32, shape, 0)
        col = lax.broadcasted_iota(jnp.int32, shape, 1)
        base_row = pl.program_id(0) * block_rows
        elem = ((base_row + row) * _LANE + col).astype(jnp.uint32)
        seed_u = seed_ref[0].astype(jnp.uint32)
        sample_bits = _hash_u32(elem, seed_u, 0x3C6EF372)
        mask_bits = _hash_u32(elem, seed_u, 0x78DDE6E5) if need_mask else None

    # bernoulli(sigmoid(x)) sample.
    u = _bits_to_unit_float(sample_bits)
    sample = (u < sig).astype(jnp.float32)

    if not need_mask:                         # hardness >= 1
        out = sample
    else:                                     # 0 < hardness < 1
        # bernoulli(hardness) mask: compare 24 random bits against a
        # compile-time integer threshold (no float round trip).
        thr = jnp.uint32(int(round(hardness * float(1 << 24))))
        mask = (mask_bits >> jnp.uint32(8)) < thr
        out = jnp.where(mask, sample, sig)

    o_ref[...] = out.astype(o_ref.dtype)


def sigmoid_pcff(x, *, hardness, training=False, seed=0):
    """Forward pass of SigmoidPCFF on an arbitrary-shape tensor."""
    hardness = float(hardness)

    # Eval / hardness<=0 path: deterministic sigmoid, no RNG.  Skip the Pallas
    # round-trip entirely; XLA emits a single fused elementwise op.
    if not (training and hardness > 0.0):
        return jax.nn.sigmoid(x)

    orig_shape = x.shape
    orig_dtype = x.dtype

    flat = x.reshape(-1)
    n = flat.shape[0]

    # Pad only to the minimum native tile: 8 sublanes for 4-byte dtypes,
    # 16 for bf16, 32 for int8 (a few KiB at most).
    sublane = max(8, 32 // jnp.dtype(orig_dtype).itemsize)
    min_elems = sublane * _LANE
    n_pad = (-n) % min_elems
    if n_pad:
        flat = jnp.pad(flat, (0, n_pad))

    x2 = flat.reshape(-1, _LANE)
    rows = x2.shape[0]

    # MiB-scale lane-dense blocks; the last (possibly partial) block is masked
    # by Pallas (cdiv grid) instead of padding the tensor to a block multiple.
    block_rows = min(rows, _MAX_BLOCK_ROWS)
    grid = (pl.cdiv(rows, block_rows),)

    # Hardware PRNG on a real TPU backend; portable counter hash otherwise.
    use_hw_prng = jax.default_backend() == "tpu"

    seed_arr = jnp.asarray([seed], dtype=jnp.int32)
    kernel = functools.partial(
        _sigmoid_pcff_kernel,
        hardness=hardness,
        block_rows=block_rows,
        use_hw_prng=use_hw_prng,
    )

    out2 = pl.pallas_call(
        kernel,
        out_shape=jax.ShapeDtypeStruct((rows, _LANE), orig_dtype),
        grid_spec=pltpu.PrefetchScalarGridSpec(
            num_scalar_prefetch=1,
            grid=grid,
            in_specs=[pl.BlockSpec((block_rows, _LANE), lambda i, seed: (i, 0))],
            out_specs=pl.BlockSpec((block_rows, _LANE), lambda i, seed: (i, 0)),
        ),
        compiler_params=pltpu.CompilerParams(
            # Per-tile (re)seeding -> tiles independent; v7x shards across TCs.
            dimension_semantics=("parallel",),
            vmem_limit_bytes=32 * 1024 * 1024,
        ),
    )(seed_arr, x2)

    out_flat = out2.reshape(-1)
    if n_pad:
        out_flat = out_flat[:n]
    return out_flat.reshape(orig_shape)


if __name__ == "__main__":
    key = jax.random.PRNGKey(0)
    # Small NCHW-like input consistent with the (shape-agnostic) module.
    x = jax.random.normal(key, (2, 4, 16, 16), dtype=jnp.float32)
    hardness = 0.5  # module constructor arg

    # Eval mode: exact sigmoid.
    out_eval = sigmoid_pcff(x, hardness=hardness, training=False)
    jax.block_until_ready(out_eval)
    assert jnp.allclose(out_eval, jax.nn.sigmoid(x), atol=1e-6), "eval-mode mismatch"

    # Training, 0 < hardness < 1: each element is either a {0,1} bernoulli
    # sample (where mask fired) or sigmoid(x) (where it did not).
    out_train = sigmoid_pcff(x, hardness=hardness, training=True, seed=1234)
    jax.block_until_ready(out_train)
    assert out_train.shape == x.shape and out_train.dtype == x.dtype
    sig = jax.nn.sigmoid(x)
    is_binary = (out_train == 0.0) | (out_train == 1.0)
    is_sig = jnp.abs(out_train - sig) <= 1e-5
    assert bool(jnp.all(is_binary | is_sig)), "value neither sampled nor sigmoid"
    frac_binary = float(jnp.mean(is_binary.astype(jnp.float32)))
    assert 0.3 < frac_binary < 0.7, f"mask rate {frac_binary} far from hardness 0.5"

    # Training, hardness >= 1: pure bernoulli(sigmoid(x)) -> all outputs in {0,1}.
    out_hard = sigmoid_pcff(x, hardness=1.0, training=True, seed=7)
    jax.block_until_ready(out_hard)
    assert bool(jnp.all((out_hard == 0.0) | (out_hard == 1.0)))
    mean_hard = float(jnp.mean(out_hard))
    assert 0.25 < mean_hard < 0.75, f"sample mean {mean_hard} looks degenerate"

    print("KERNEL_OK")
</pallas_src>

<mosaic_0001>
module attributes {stable_mosaic.version = 11 : i64} {
  func.func @_sigmoid_pcff_kernel(%arg0: i32, %arg1: memref<1xi32, #tpu.memory_space<smem>>, %arg2: memref<16x128xf32, #tpu.memory_space<vmem>>, %arg3: memref<16x128xf32, #tpu.memory_space<vmem>>) attributes {dimension_semantics = [#tpu.dimension_semantics<parallel>], iteration_bounds = array<i64: 1>, scalar_prefetch = 1 : i64, scratch_operands = 0 : i64, tpu.core_type = #tpu.core_type<tc>, window_params = [{transform_indices = @transform_0, window_bounds = array<i64: 16, 128>}, {transform_indices = @transform_1, window_bounds = array<i64: 16, 128>}]} {
    %c0 = arith.constant 0 : index
    %c0_0 = arith.constant 0 : index
    %0 = vector.load %arg2[%c0, %c0_0] : memref<16x128xf32, #tpu.memory_space<vmem>>, vector<16x128xf32>
    %cst = arith.constant 0.000000e+00 : f32
    %1 = vector.broadcast %cst : f32 to vector<16x128xf32>
    %2 = arith.subf %1, %0 : vector<16x128xf32>
    %3 = math.exp %2 : vector<16x128xf32>
    %cst_1 = arith.constant 1.000000e+00 : f32
    %4 = vector.broadcast %cst_1 : f32 to vector<16x128xf32>
    %5 = arith.addf %4, %3 : vector<16x128xf32>
    %cst_2 = arith.constant 1.000000e+00 : f32
    %6 = vector.broadcast %cst_2 : f32 to vector<16x128xf32>
    %7 = arith.divf %6, %5 : vector<16x128xf32>
    %8 = tpu.iota {dimensions = array<i32: 0>} : vector<16x128xi32>
    %9 = tpu.iota {dimensions = array<i32: 1>} : vector<16x128xi32>
    %c16_i32 = arith.constant 16 : i32
    %10 = arith.muli %arg0, %c16_i32 : i32
    %11 = vector.broadcast %10 : i32 to vector<16x128xi32>
    %12 = arith.addi %11, %8 : vector<16x128xi32>
    %c128_i32 = arith.constant 128 : i32
    %13 = vector.broadcast %c128_i32 : i32 to vector<16x128xi32>
    %14 = arith.muli %12, %13 : vector<16x128xi32>
    %15 = arith.addi %14, %9 : vector<16x128xi32>
    %c0_3 = arith.constant 0 : index
    %16 = memref.load %arg1[%c0_3] : memref<1xi32, #tpu.memory_space<smem>>
    %c-1640531527_i32 = arith.constant -1640531527 : i32
    %17 = vector.broadcast %c-1640531527_i32 : i32 to vector<16x128xi32>
    %18 = arith.muli %15, %17 : vector<16x128xi32>
    %c-2048144789_i32 = arith.constant -2048144789 : i32
    %19 = arith.muli %16, %c-2048144789_i32 : i32
    %c1013904242_i32 = arith.constant 1013904242 : i32
    %20 = arith.addi %19, %c1013904242_i32 : i32
    %21 = vector.broadcast %20 : i32 to vector<16x128xi32>
    %22 = arith.xori %18, %21 : vector<16x128xi32>
    %c16_i32_4 = arith.constant 16 : i32
    %23 = vector.broadcast %c16_i32_4 : i32 to vector<16x128xi32>
    %24 = arith.shrui %22, %23 : vector<16x128xi32>
    %25 = arith.xori %22, %24 : vector<16x128xi32>
    %c2146121005_i32 = arith.constant 2146121005 : i32
    %26 = vector.broadcast %c2146121005_i32 : i32 to vector<16x128xi32>
    %27 = arith.muli %25, %26 : vector<16x128xi32>
    %c15_i32 = arith.constant 15 : i32
    %28 = vector.broadcast %c15_i32 : i32 to vector<16x128xi32>
    %29 = arith.shrui %27, %28 : vector<16x128xi32>
    %30 = arith.xori %27, %29 : vector<16x128xi32>
    %c-2073254261_i32 = arith.constant -2073254261 : i32
    %31 = vector.broadcast %c-2073254261_i32 : i32 to vector<16x128xi32>
    %32 = arith.muli %30, %31 : vector<16x128xi32>
    %c16_i32_5 = arith.constant 16 : i32
    %33 = vector.broadcast %c16_i32_5 : i32 to vector<16x128xi32>
    %34 = arith.shrui %32, %33 : vector<16x128xi32>
    %35 = arith.xori %32, %34 : vector<16x128xi32>
    %c-1640531535_i32 = arith.constant -1640531535 : i32
    %36 = vector.broadcast %c-1640531535_i32 : i32 to vector<16x128xi32>
    %37 = arith.muli %35, %36 : vector<16x128xi32>
    %c15_i32_6 = arith.constant 15 : i32
    %38 = vector.broadcast %c15_i32_6 : i32 to vector<16x128xi32>
    %39 = arith.shrui %37, %38 : vector<16x128xi32>
    %40 = arith.xori %37, %39 : vector<16x128xi32>
    %c-1640531527_i32_7 = arith.constant -1640531527 : i32
    %41 = vector.broadcast %c-1640531527_i32_7 : i32 to vector<16x128xi32>
    %42 = arith.muli %15, %41 : vector<16x128xi32>
    %c-2048144789_i32_8 = arith.constant -2048144789 : i32
    %43 = arith.muli %16, %c-2048144789_i32_8 : i32
    %c2027808485_i32 = arith.constant 2027808485 : i32
    %44 = arith.addi %43, %c2027808485_i32 : i32
    %45 = vector.broadcast %44 : i32 to vector<16x128xi32>
    %46 = arith.xori %42, %45 : vector<16x128xi32>
    %c16_i32_9 = arith.constant 16 : i32
    %47 = vector.broadcast %c16_i32_9 : i32 to vector<16x128xi32>
    %48 = arith.shrui %46, %47 : vector<16x128xi32>
    %49 = arith.xori %46, %48 : vector<16x128xi32>
    %c2146121005_i32_10 = arith.constant 2146121005 : i32
    %50 = vector.broadcast %c2146121005_i32_10 : i32 to vector<16x128xi32>
    %51 = arith.muli %49, %50 : vector<16x128xi32>
    %c15_i32_11 = arith.constant 15 : i32
    %52 = vector.broadcast %c15_i32_11 : i32 to vector<16x128xi32>
    %53 = arith.shrui %51, %52 : vector<16x128xi32>
    %54 = arith.xori %51, %53 : vector<16x128xi32>
    %c-2073254261_i32_12 = arith.constant -2073254261 : i32
    %55 = vector.broadcast %c-2073254261_i32_12 : i32 to vector<16x128xi32>
    %56 = arith.muli %54, %55 : vector<16x128xi32>
    %c16_i32_13 = arith.constant 16 : i32
    %57 = vector.broadcast %c16_i32_13 : i32 to vector<16x128xi32>
    %58 = arith.shrui %56, %57 : vector<16x128xi32>
    %59 = arith.xori %56, %58 : vector<16x128xi32>
    %c-1640531535_i32_14 = arith.constant -1640531535 : i32
    %60 = vector.broadcast %c-1640531535_i32_14 : i32 to vector<16x128xi32>
    %61 = arith.muli %59, %60 : vector<16x128xi32>
    %c15_i32_15 = arith.constant 15 : i32
    %62 = vector.broadcast %c15_i32_15 : i32 to vector<16x128xi32>
    %63 = arith.shrui %61, %62 : vector<16x128xi32>
    %64 = arith.xori %61, %63 : vector<16x128xi32>
    %c9_i32 = arith.constant 9 : i32
    %65 = vector.broadcast %c9_i32 : i32 to vector<16x128xi32>
    %66 = arith.shrui %40, %65 : vector<16x128xi32>
    %c1065353216_i32 = arith.constant 1065353216 : i32
    %67 = vector.broadcast %c1065353216_i32 : i32 to vector<16x128xi32>
    %68 = arith.ori %66, %67 : vector<16x128xi32>
    %69 = tpu.bitcast %68 : vector<16x128xi32> -> vector<16x128xf32>
    %cst_16 = arith.constant 1.000000e+00 : f32
    %70 = vector.broadcast %cst_16 : f32 to vector<16x128xf32>
    %71 = arith.subf %69, %70 : vector<16x128xf32>
    %72 = arith.cmpf olt, %71, %7 : vector<16x128xf32>
    %73 = arith.extui %72 : vector<16x128xi1> to vector<16x128xi32>
    %74 = arith.sitofp %73 : vector<16x128xi32> to vector<16x128xf32>
    %c8_i32 = arith.constant 8 : i32
    %75 = vector.broadcast %c8_i32 : i32 to vector<16x128xi32>
    %76 = arith.shrui %64, %75 : vector<16x128xi32>
    %c8388608_i32 = arith.constant 8388608 : i32
    %77 = vector.broadcast %c8388608_i32 : i32 to vector<16x128xi32>
    %78 = arith.cmpi ult, %76, %77 : vector<16x128xi32>
    %79 = arith.select %78, %74, %7 : vector<16x128xi1>, vector<16x128xf32>
    %c0_17 = arith.constant 0 : index
    %c0_18 = arith.constant 0 : index
    %80 = vector.load %arg3[%c0_17, %c0_18] : memref<16x128xf32, #tpu.memory_space<vmem>>, vector<16x128xf32>
    tpu.vector_store %arg3[%c0_17, %c0_18], %79 {strides = array<i32>} : memref<16x128xf32, #tpu.memory_space<vmem>>, vector<16x128xf32>,
    return
  }
  func.func @transform_0(%arg0: i32, %arg1: memref<1xi32, #tpu.memory_space<smem>>) -> (i32, i32) {
    %c0_i32 = arith.constant 0 : i32
    %c0_i32_0 = arith.constant 0 : i32
    return %arg0, %c0_i32 : i32, i32
  }
  func.func @transform_1(%arg0: i32, %arg1: memref<1xi32, #tpu.memory_space<smem>>) -> (i32, i32) {
    %c0_i32 = arith.constant 0 : i32
    %c0_i32_0 = arith.constant 0 : i32
    return %arg0, %c0_i32 : i32, i32
  }
}

</mosaic_0001>

<bundles_post_ra>
// kernel: tpu_custom_call.1
= control target key start
LH: loop header
LB: loop body
LE: loop exit
PB: predicated region body
PF: predicated region fallthrough
CT: control target
= control target key end

     0   :  { %8 = vsyncpa [#allocation5], 0  ;;  %s265_s0 = inlined_call_operand.<no memory space> [shape: s32[1], index: 0, kind: input, shape index: {}]   ;;  %s266_s1 = inlined_call_operand.hbm [shape: f32[16,128], index: 1, kind: input, shape index: {}]   ;;  %s267_s2 = inlined_call_operand.hbm [shape: f32[16,128], index: 2, kind: output, shape index: {}]  }
   0x1   :  { %9 = vsyncpa [#allocation6], 0  ;;  %s212_s9 = smov [#allocation4]   ;;  %s164_s13 = scalar_lea.hbm %s266_s1, 256 }
   0x2   :  { %s15_s10 = sshll.u32 %s212_s9, 4  ;;  %p165_p0 = scmp.ne.s32.totalorder %s266_s1, %s164_s13  ;;  %s16_s10 = int_to_ptr.vmem [resolvable:$true] %s15_s10 }
   0x3   :  { %p168_p1 = scmp.lt.u32.totalorder %s164_s13, %s266_s1 }
   0x5   :  { %p170_p2 = pnand %p168_p1, %p165_p0 }
   0x7   :  { %173 = shalt.err (!%p170_p2)
}
   0x8   :  { %s174_s18 = scalar_lea.vmem %s16_s10, 256  ;;  %p179_p4 = scmp.lt.s32.totalorder %s16_s10, %s16_s10 }
   0x9   :  { %p175_p3 = scmp.ne.s32.totalorder %s16_s10, %s174_s18  ;;  %p180_p5 = scmp.lt.s32.totalorder %s174_s18, %s174_s18 }
   0xb   :  { %p181_p6 = por %p180_p5, %p179_p4 }
   0xd   :  { %p182_p7 = pnand %p181_p6, %p175_p3 }
   0xf   :  { %185 = shalt.err (!%p182_p7)
}
  0x10   :  { %s213_s19 = smov 128   ;;  %s214_s20 = smov 8  }
  0x11   :  { %21 = dma.hbm_to_vmem [thread:$0]  %s266_s1, 256, %s16_s10, [#allocation5], %s213_s19, %s213_s19, %s214_s20  }
  0x12   :  { %208 = dma.done.wait [#allocation5], 256  }
  0x13   :  { %209 = vsyncadd [#allocation5], 4294967040  ;;  %v39_v0 = vlaneseq  ;;  %s55_s25 = smul.u32 2246822507, %s265_s0  ;;  %v25_v7 = vld [vmem:[#allocation4] sm:$0xff]  ;;  %v26_v10 = vld [vmem:[#allocation4 + $0x8] sm:$0xff] }
  0x14   :  { %v27_v11 = vsub.f32 0.0, %v25_v7  ;;  %v28_v13 = vsub.f32 0.0, %v26_v10  ;;  %s216_s0 = smov [#allocation7]  }
  0x15   :  { %v40_v1 = vshrl.u32 %v39_v0, 7  ;;  %v43_v2 = vand.u32 127, %v39_v0  ;;  %s56_s26 = sadd.s32 1013904242, %s55_s25  ;;  %s82_s27 = sadd.s32 2027808485, %s55_s25 }
  0x16   :  { %v57_v8 = vstv %s56_s26  ;;  %v83_v9 = vstv %s82_s27  ;;  %v29_v15 = vmul.f32 1.442695, %v27_v11  ;;  %v31_v18 = vmul.f32 1.442695, %v28_v13  ;;  %s135_s1 = sshll.u32 %s216_s0, 4  ;;  %s136_s1 = int_to_ptr.vmem [resolvable:$true] %s135_s1 }
  0x17   :  { %v48_v3 = vmul.u32 128, %v40_v1  ;;  %v41_v4 = vadd.s32 8, %v40_v1  ;;  %s186_s28 = scalar_lea.vmem %s136_s1, 256  ;;  %p191_p9 = scmp.lt.s32.totalorder %s136_s1, %s136_s1 }
  0x18   :  { %156 = vpow2.f32 %v29_v15  ;;  %v215_v15 = vmov 0.0   ;;  %p187_p8 = scmp.ne.s32.totalorder %s136_s1, %s186_s28  ;;  %p192_p10 = scmp.lt.s32.totalorder %s186_s28, %s186_s28 }
  0x19   :  { %v50_v5 = vadd.s32 %v48_v3, %v43_v2  ;;  %v49_v6 = vmul.u32 128, %v41_v4  ;;  %158 = vpow2.f32 %v31_v18 }
  0x1a   :  { %p193_p11 = por %p192_p10, %p191_p9 }
  0x1b   :  { %v53_v12 = vmul.u32 2654435769, %v50_v5  ;;  %v51_v14 = vadd.s32 %v49_v6, %v43_v2 }
  0x1c   :  { %p194_p12 = pnand %p193_p11, %p187_p8 }
  0x1d   :  { %v58_v16 = vxor.u32 %v57_v8, %v53_v12  ;;  %v84_v17 = vxor.u32 %v83_v9, %v53_v12  ;;  %v54_v19 = vmul.u32 2654435769, %v51_v14 }
  0x1f   :  { %v60_v20 = vshrl.u32 %v58_v16, 16  ;;  %v86_v21 = vshrl.u32 %v84_v17, 16  ;;  %v59_v22 = vxor.u32 %v57_v8, %v54_v19  ;;  %v85_v23 = vxor.u32 %v83_v9, %v54_v19 }
  0x21   :  { %v62_v24 = vxor.u32 %v60_v20, %v58_v16  ;;  %v88_v25 = vxor.u32 %v86_v21, %v84_v17  ;;  %v61_v26 = vshrl.u32 %v59_v22, 16  ;;  %v87_v27 = vshrl.u32 %v85_v23, 16 }
  0x22   :  { %v157_v40 = vpop.eup %156 }
  0x23   :  { %v64_v28 = vmul.u32 2146121005, %v62_v24  ;;  %v90_v29 = vmul.u32 2146121005, %v88_v25  ;;  %v63_v30 = vxor.u32 %v61_v26, %v59_v22  ;;  %v89_v31 = vxor.u32 %v87_v27, %v85_v23  ;;  %v159_v43 = vpop.eup %158 }
  0x24   :  { %v33_v44 = vadd.f32 1.0, %v157_v40  ;;  %v34_v53 = vadd.f32 1.0, %v159_v43 }
  0x25   :  { %v66_v32 = vshrl.u32 %v64_v28, 15  ;;  %v92_v33 = vshrl.u32 %v90_v29, 15  ;;  %v65_v34 = vmul.u32 2146121005, %v63_v30  ;;  %v91_v35 = vmul.u32 2146121005, %v89_v31 }
  0x26   :  { %160 = vrcp.f32 %v33_v44 }
  0x27   :  { %v68_v36 = vxor.u32 %v66_v32, %v64_v28  ;;  %v94_v37 = vxor.u32 %v92_v33, %v90_v29  ;;  %v67_v38 = vshrl.u32 %v65_v34, 15  ;;  %v93_v39 = vshrl.u32 %v91_v35, 15 }
  0x28   :  { %162 = vrcp.f32 %v34_v53 }
  0x29   :  { %v70_v41 = vmul.u32 2221713035, %v68_v36  ;;  %v96_v42 = vmul.u32 2221713035, %v94_v37  ;;  %v69_v45 = vxor.u32 %v67_v38, %v65_v34  ;;  %v95_v46 = vxor.u32 %v93_v39, %v91_v35 }
  0x2b   :  { %v72_v47 = vshrl.u32 %v70_v41, 16  ;;  %v98_v48 = vshrl.u32 %v96_v42, 16  ;;  %v71_v49 = vmul.u32 2221713035, %v69_v45  ;;  %v97_v50 = vmul.u32 2221713035, %v95_v46 }
  0x2d   :  { %v74_v51 = vxor.u32 %v72_v47, %v70_v41  ;;  %v100_v52 = vxor.u32 %v98_v48, %v96_v42  ;;  %v73_v54 = vshrl.u32 %v71_v49, 16  ;;  %v99_v55 = vshrl.u32 %v97_v50, 16 }
  0x2f   :  { %v76_v56 = vmul.u32 2654435761, %v74_v51  ;;  %v102_v57 = vmul.u32 2654435761, %v100_v52  ;;  %v75_v58 = vxor.u32 %v73_v54, %v71_v49  ;;  %v101_v59 = vxor.u32 %v99_v55, %v97_v50 }
  0x30   :  { %v161_v9 = vpop.eup %160 }
  0x31   :  { %v78_v60 = vshrl.u32 %v76_v56, 15  ;;  %v104_v61 = vshrl.u32 %v102_v57, 15  ;;  %v77_v62 = vmul.u32 2654435761, %v75_v58  ;;  %v103_v63 = vmul.u32 2654435761, %v101_v59 }
  0x32   :  { %v163_v14 = vpop.eup %162 }
  0x33   :  { %v80_v0 = vxor.u32 %v78_v60, %v76_v56  ;;  %v106_v1 = vxor.u32 %v104_v61, %v102_v57  ;;  %v79_v2 = vshrl.u32 %v77_v62, 15  ;;  %v105_v3 = vshrl.u32 %v103_v63, 15 }
  0x35   :  { %v108_v4 = vshrl.u32 %v80_v0, 9  ;;  %v122_v5 = vshrl.u32 %v106_v1, 8  ;;  %v81_v6 = vxor.u32 %v79_v2, %v77_v62  ;;  %v107_v7 = vxor.u32 %v105_v3, %v103_v63 }
  0x37   :  { %v110_v8 = vor.u32 1065353216, %v108_v4  ;;  %v109_v10 = vshrl.u32 %v81_v6, 9  ;;  %v123_v12 = vshrl.u32 %v107_v7, 8  ;;  %vm124_vm0 = vcmp.lt.u32.totalorder %v122_v5, 8388608 }
  0x39   :  { %v147_v11 = vadd.f32 -1.0, %v110_v8  ;;  %v111_v13 = vor.u32 1065353216, %v109_v10  ;;  %vm125_vm2 = vcmp.lt.u32.totalorder %v123_v12, 8388608 }
  0x3b   :  { %vm116_vm1 = vcmp.lt.f32.partialorder %v147_v11, %v161_v9  ;;  %v148_v17 = vadd.f32 -1.0, %v111_v13 }
  0x3c   :  { %v149_v16 = vsel %vm116_vm1, 1.0, %v215_v15 }
  0x3d   :  { %v126_v18 = vsel %vm124_vm0, %v149_v16, %v161_v9  ;;  %vm117_vm3 = vcmp.lt.f32.partialorder %v148_v17, %v163_v14 }
  0x3e   :  { %128 = vst [vmem:[#allocation7] sm:$0xff] %v126_v18  ;;  %v150_v19 = vsel %vm117_vm3, 1.0, %v215_v15 }
  0x3f   :  { %v127_v20 = vsel %vm125_vm2, %v150_v19, %v163_v14 }
  0x40   :  { %129 = vst [vmem:[#allocation7 + $0x8] sm:$0xff] %v127_v20 }
  0x41   :  { %197 = shalt.err (!%p194_p12)
}
  0x42   :  { %s198_s3 = scalar_lea.hbm %s267_s2, 256 }
  0x43   :  { %p199_p13 = scmp.ne.s32.totalorder %s267_s2, %s198_s3  ;;  %p202_p0 = scmp.lt.u32.totalorder %s198_s3, %s267_s2 }
  0x45   :  { %p204_p1 = pnand %p202_p0, %p199_p13 }
  0x47   :  { %207 = shalt.err (!%p204_p1)
}
  0x48   :  { %141 = dma.vmem_to_hbm [thread:$0]  %s136_s1, 256, %s267_s2, [#allocation6], %s213_s19, %s213_s19, %s214_s20  }
  0x49   :  { %210 = dma.done.wait [#allocation6], 256  }
  0x4a   :  { %211 = vsyncadd [#allocation6], 4294967040 }
  0x4b   :  { %145 = vsyncpa [#allocation5], 1 }
  0x4c   :  { %146 = vsyncpa [#allocation6], 1 }

</bundles_post_ra>
